<compile_context>
chip_gen: v5e
topology: v5e:2x2
jax: 0.10.0
libtpu: 0.0.40
codegen_flags: <defaults>
</compile_context>

<pallas_src>
import jax
import jax.numpy as jnp
from jax.experimental import pallas as pl
from jax.experimental.pallas import tpu as pltpu


def _round_up(x, m):
    return ((x + m - 1) // m) * m


def fusion_attention_kernel(text_ref, img_ref, sp_ref,
                            wt_ref, wi_ref, w1t_ref, w1i_ref, w2_ref,
                            out_ref):
    """Fused forward pass on one (TB,) batch tile.

    sp_ref packs every tiny (1, N) parameter into one (8, hidden) f32 slab:
      row 0: text-encoder bias        (d_text lanes)
      row 1: image-encoder bias       (d_img lanes)
      row 2: text attention weight    (d_text lanes)
      row 3: image attention weight   (d_img lanes)
      row 4: text attention bias      (lane 0)
      row 5: image attention bias     (lane 0)
      row 6: classifier output bias   (out_dim lanes)
      row 7: classifier hidden bias   (hidden lanes)
    """
    d_text = wt_ref.shape[1]
    d_img = wi_ref.shape[1]
    out_dim = out_ref.shape[1]

    # ---- encoders: Linear + ReLU (bf16 MXU operands, f32 accumulation) ----
    tf = jnp.dot(text_ref[...], wt_ref[...],
                 preferred_element_type=jnp.float32) + sp_ref[0:1, :d_text]
    tf = jnp.maximum(tf, 0.0)                                     # (TB, d_text) f32

    imf = jnp.dot(img_ref[...], wi_ref[...],
                  preferred_element_type=jnp.float32) + sp_ref[1:2, :d_img]
    imf = jnp.maximum(imf, 0.0)                                   # (TB, d_img) f32

    # ---- attention fusion: sigmoid(Linear(feat, 1)) gates, normalized ----
    ta = jax.nn.sigmoid(jnp.sum(tf * sp_ref[2:3, :d_text], axis=1, keepdims=True)
                        + sp_ref[4:5, 0:1])                       # (TB, 1)
    ia = jax.nn.sigmoid(jnp.sum(imf * sp_ref[3:4, :d_img], axis=1, keepdims=True)
                        + sp_ref[5:6, 0:1])                       # (TB, 1)
    inv = pl.reciprocal(ta + ia, approx=True)   # one EUP vrcp instead of two divides
    ta = ta * inv
    ia = ia * inv

    # ---- classifier: Dropout -> Linear(fusion,512) -> ReLU -> Dropout -> Linear ----
    # TODO(synk): nn.Dropout treated as identity (eval/inference mode).
    # Split-w1 accumulate replaces the lane concat of [tf*ta, imf*ia].
    h = (jnp.dot((tf * ta).astype(jnp.bfloat16), w1t_ref[...],
                 preferred_element_type=jnp.float32)
         + jnp.dot((imf * ia).astype(jnp.bfloat16), w1i_ref[...],
                   preferred_element_type=jnp.float32)
         + sp_ref[7:8, :])
    h = jnp.maximum(h, 0.0)                                       # (TB, hidden) f32

    # Direct (TB, out_dim) store — unpadded w2 keeps weight DMA minimal.
    out_ref[...] = (jnp.dot(h.astype(jnp.bfloat16), w2_ref[...],
                            preferred_element_type=jnp.float32)
                    + sp_ref[6:7, :out_dim])


def _resident_spec(shape):
    """Full-array block whose index_map is constant: DMA'd once, stays resident."""
    nd = len(shape)
    return pl.BlockSpec(shape, lambda i, nd=nd: (0,) * nd)


def fusion_model_forward(text, image, params, *, batch_tile=128):
    """text: (B, D_text_in) f32; image: (B, C, H, W) f32 (NCHW, like PyTorch)."""
    B = text.shape[0]
    out_dim = params["out_dim"]

    # Glue: NCHW -> (B, C*H*W) row-major, activations cast to bf16 here
    # (the dot would truncate the LHS to bf16 anyway; this halves activation DMA).
    img_flat = image.reshape(B, -1).astype(jnp.bfloat16)
    text_bf = text.astype(jnp.bfloat16)

    # Batch tiling: TB rows per grid step (sublane-aligned); pad B up to a
    # multiple of TB. Weights are fetched once; activation/output tiles stream.
    TB = min(batch_tile, _round_up(B, 8))
    Bp = _round_up(B, TB)
    if Bp != B:
        text_bf = jnp.pad(text_bf, ((0, Bp - B), (0, 0)))
        img_flat = jnp.pad(img_flat, ((0, Bp - B), (0, 0)))
    grid = (Bp // TB,)

    text_in = text_bf.shape[1]
    img_in = img_flat.shape[1]

    inputs = (text_bf, img_flat, params["sp"],
              params["wt"], params["wi"],
              params["w1t"], params["w1i"], params["w2"])

    in_specs = [
        pl.BlockSpec((TB, text_in), lambda i: (i, 0)),     # streamed per tile
        pl.BlockSpec((TB, img_in), lambda i: (i, 0)),      # streamed per tile
        _resident_spec(params["sp"].shape),                # resident
        _resident_spec(params["wt"].shape),                # resident
        _resident_spec(params["wi"].shape),                # resident
        _resident_spec(params["w1t"].shape),               # resident
        _resident_spec(params["w1i"].shape),               # resident
        _resident_spec(params["w2"].shape),                # resident
    ]
    out_specs = pl.BlockSpec((TB, out_dim), lambda i: (i, 0))

    flops = 2 * Bp * (text_in * params["wt"].shape[1]
                      + img_in * params["wi"].shape[1]
                      + params["w1t"].shape[0] * params["w1t"].shape[1]
                      + params["w1i"].shape[0] * params["w1i"].shape[1]
                      + params["w2"].shape[0] * out_dim)
    bytes_accessed = (sum(int(a.size) * a.dtype.itemsize for a in inputs)
                      + Bp * out_dim * 4)

    out = pl.pallas_call(
        fusion_attention_kernel,
        out_shape=jax.ShapeDtypeStruct((Bp, out_dim), jnp.float32),
        grid=grid,
        in_specs=in_specs,
        out_specs=out_specs,
        compiler_params=pltpu.CompilerParams(
            dimension_semantics=("parallel",)),   # v7x: shard batch over 2 TCs
        cost_estimate=pl.CostEstimate(flops=flops,
                                      transcendentals=3 * Bp,
                                      bytes_accessed=bytes_accessed),
    )(*inputs)
    return out[:B]


def init_params(key, *, text_in, img_in, d_text, d_img, hidden, out_dim):
    ks = jax.random.split(key, 12)
    s = 0.02
    assert max(d_text, d_img, out_dim) <= hidden, "param slab width = hidden"

    # f32 masters (matching PyTorch layout: weight (in, out), bias (out,))
    wt = s * jax.random.normal(ks[0], (text_in, d_text), jnp.float32)
    bt = s * jax.random.normal(ks[1], (d_text,), jnp.float32)
    wi = s * jax.random.normal(ks[2], (img_in, d_img), jnp.float32)
    bi = s * jax.random.normal(ks[3], (d_img,), jnp.float32)
    wta = s * jax.random.normal(ks[4], (d_text,), jnp.float32)
    bta = s * jax.random.normal(ks[5], (), jnp.float32)
    wia = s * jax.random.normal(ks[6], (d_img,), jnp.float32)
    bia = s * jax.random.normal(ks[7], (), jnp.float32)
    w1 = s * jax.random.normal(ks[8], (d_text + d_img, hidden), jnp.float32)
    b1 = s * jax.random.normal(ks[9], (hidden,), jnp.float32)
    w2 = s * jax.random.normal(ks[10], (hidden, out_dim), jnp.float32)
    b2 = s * jax.random.normal(ks[11], (out_dim,), jnp.float32)

    # Pack all tiny params into one (8, hidden) f32 slab (one DMA instead of 8).
    sp = jnp.zeros((8, hidden), jnp.float32)
    sp = sp.at[0, :d_text].set(bt)
    sp = sp.at[1, :d_img].set(bi)
    sp = sp.at[2, :d_text].set(wta)
    sp = sp.at[3, :d_img].set(wia)
    sp = sp.at[4, 0].set(bta)
    sp = sp.at[5, 0].set(bia)
    sp = sp.at[6, :out_dim].set(b2)
    sp = sp.at[7, :].set(b1)

    # Matmul weights stored bf16 (halves weight DMA bytes); w2 kept unpadded.
    return {
        "sp": sp,
        "wt": wt.astype(jnp.bfloat16),
        "wi": wi.astype(jnp.bfloat16),
        "w1t": w1[:d_text].astype(jnp.bfloat16),
        "w1i": w1[d_text:].astype(jnp.bfloat16),
        "w2": w2.astype(jnp.bfloat16),
        "out_dim": out_dim,
    }


if __name__ == "__main__":
    B, TEXT_IN = 8, 32
    C, H, W = 4, 16, 16
    D_TEXT = D_IMG = 64
    HIDDEN, OUT_DIM = 512, 10

    key = jax.random.PRNGKey(0)
    k_text, k_img, k_params = jax.random.split(key, 3)

    text = jax.random.normal(k_text, (B, TEXT_IN), jnp.float32)
    image = jax.random.normal(k_img, (B, C, H, W), jnp.float32)   # NCHW
    params = init_params(k_params, text_in=TEXT_IN, img_in=C * H * W,
                         d_text=D_TEXT, d_img=D_IMG,
                         hidden=HIDDEN, out_dim=OUT_DIM)

    out = fusion_model_forward(text, image, params)
    jax.block_until_ready(out)
    assert out.shape == (B, OUT_DIM) and out.dtype == jnp.float32
    assert bool(jnp.all(jnp.isfinite(out)))
    print("KERNEL_OK")
</pallas_src>

<mosaic_0001>
module attributes {stable_mosaic.version = 11 : i64} {
  func.func @fusion_attention_kernel(%arg0: i32, %arg1: memref<8x32xbf16, #tpu.memory_space<vmem>>, %arg2: memref<8x1024xbf16, #tpu.memory_space<vmem>>, %arg3: memref<8x512xf32, #tpu.memory_space<vmem>>, %arg4: memref<32x64xbf16, #tpu.memory_space<vmem>>, %arg5: memref<1024x64xbf16, #tpu.memory_space<vmem>>, %arg6: memref<64x512xbf16, #tpu.memory_space<vmem>>, %arg7: memref<64x512xbf16, #tpu.memory_space<vmem>>, %arg8: memref<512x10xbf16, #tpu.memory_space<vmem>>, %arg9: memref<8x10xf32, #tpu.memory_space<vmem>>) attributes {dimension_semantics = [#tpu.dimension_semantics<parallel>], iteration_bounds = array<i64: 1>, scalar_prefetch = 0 : i64, scratch_operands = 0 : i64, tpu.core_type = #tpu.core_type<tc>, window_params = [{transform_indices = @transform_0, window_bounds = array<i64: 8, 32>}, {transform_indices = @transform_1, window_bounds = array<i64: 8, 1024>}, {pipeline_mode = #tpu.pipeline_mode<synchronous>, transform_indices = @transform_2, window_bounds = array<i64: 8, 512>}, {pipeline_mode = #tpu.pipeline_mode<synchronous>, transform_indices = @transform_3, window_bounds = array<i64: 32, 64>}, {pipeline_mode = #tpu.pipeline_mode<synchronous>, transform_indices = @transform_4, window_bounds = array<i64: 1024, 64>}, {pipeline_mode = #tpu.pipeline_mode<synchronous>, transform_indices = @transform_5, window_bounds = array<i64: 64, 512>}, {pipeline_mode = #tpu.pipeline_mode<synchronous>, transform_indices = @transform_6, window_bounds = array<i64: 64, 512>}, {pipeline_mode = #tpu.pipeline_mode<synchronous>, transform_indices = @transform_7, window_bounds = array<i64: 512, 10>}, {transform_indices = @transform_8, window_bounds = array<i64: 8, 10>}]} {
    %c0 = arith.constant 0 : index
    %c0_0 = arith.constant 0 : index
    %0 = vector.load %arg1[%c0, %c0_0] : memref<8x32xbf16, #tpu.memory_space<vmem>>, vector<8x32xbf16>
    %c0_1 = arith.constant 0 : index
    %c0_2 = arith.constant 0 : index
    %1 = vector.load %arg4[%c0_1, %c0_2] : memref<32x64xbf16, #tpu.memory_space<vmem>>, vector<32x64xbf16>
    %cst = arith.constant dense<0.000000e+00> : vector<8x64xf32>
    %2 = tpu.matmul %0, %1, %cst {dimension_numbers = #tpu.dot_dimension_numbers<[1], [0], [0], [1], [0, 0, 1, 1], [], []>} : vector<8x32xbf16>, vector<32x64xbf16>, vector<8x64xf32> -> vector<8x64xf32>
    %c0_3 = arith.constant 0 : index
    %c0_4 = arith.constant 0 : index
    %3 = vector.load %arg3[%c0_3, %c0_4] : memref<8x512xf32, #tpu.memory_space<vmem>>, vector<1x64xf32>
    %4 = vector.broadcast %3 : vector<1x64xf32> to vector<8x64xf32>
    %5 = arith.addf %2, %4 : vector<8x64xf32>
    %cst_5 = arith.constant 0.000000e+00 : f32
    %6 = vector.broadcast %cst_5 : f32 to vector<8x64xf32>
    %7 = arith.maximumf %5, %6 : vector<8x64xf32>
    %c0_6 = arith.constant 0 : index
    %c0_7 = arith.constant 0 : index
    %8 = vector.load %arg2[%c0_6, %c0_7] : memref<8x1024xbf16, #tpu.memory_space<vmem>>, vector<8x1024xbf16>
    %c0_8 = arith.constant 0 : index
    %c0_9 = arith.constant 0 : index
    %9 = vector.load %arg5[%c0_8, %c0_9] : memref<1024x64xbf16, #tpu.memory_space<vmem>>, vector<1024x64xbf16>
    %cst_10 = arith.constant dense<0.000000e+00> : vector<8x64xf32>
    %10 = tpu.matmul %8, %9, %cst_10 {dimension_numbers = #tpu.dot_dimension_numbers<[1], [0], [0], [1], [0, 0, 1, 1], [], []>} : vector<8x1024xbf16>, vector<1024x64xbf16>, vector<8x64xf32> -> vector<8x64xf32>
    %c1 = arith.constant 1 : index
    %c0_11 = arith.constant 0 : index
    %11 = vector.load %arg3[%c1, %c0_11] : memref<8x512xf32, #tpu.memory_space<vmem>>, vector<1x64xf32>
    %12 = vector.broadcast %11 : vector<1x64xf32> to vector<8x64xf32>
    %13 = arith.addf %10, %12 : vector<8x64xf32>
    %cst_12 = arith.constant 0.000000e+00 : f32
    %14 = vector.broadcast %cst_12 : f32 to vector<8x64xf32>
    %15 = arith.maximumf %13, %14 : vector<8x64xf32>
    %c2 = arith.constant 2 : index
    %c0_13 = arith.constant 0 : index
    %16 = vector.load %arg3[%c2, %c0_13] : memref<8x512xf32, #tpu.memory_space<vmem>>, vector<1x64xf32>
    %17 = vector.broadcast %16 : vector<1x64xf32> to vector<8x64xf32>
    %18 = arith.mulf %7, %17 : vector<8x64xf32>
    %cst_14 = arith.constant dense<0.000000e+00> : vector<8xf32>
    %19 = vector.multi_reduction <add>, %18, %cst_14 [1] : vector<8x64xf32> to vector<8xf32>
    %20 = vector.shape_cast %19 : vector<8xf32> to vector<8x1xf32>
    %c4 = arith.constant 4 : index
    %c0_15 = arith.constant 0 : index
    %21 = vector.load %arg3[%c4, %c0_15] : memref<8x512xf32, #tpu.memory_space<vmem>>, vector<1x1xf32>
    %22 = vector.broadcast %21 : vector<1x1xf32> to vector<8x1xf32>
    %23 = arith.addf %20, %22 : vector<8x1xf32>
    %24 = arith.negf %23 : vector<8x1xf32>
    %25 = math.exp %24 : vector<8x1xf32>
    %cst_16 = arith.constant 1.000000e+00 : f32
    %26 = vector.broadcast %cst_16 : f32 to vector<8x1xf32>
    %27 = arith.addf %26, %25 : vector<8x1xf32>
    %28 = arith.divf %26, %27 : vector<8x1xf32>
    %c3 = arith.constant 3 : index
    %c0_17 = arith.constant 0 : index
    %29 = vector.load %arg3[%c3, %c0_17] : memref<8x512xf32, #tpu.memory_space<vmem>>, vector<1x64xf32>
    %30 = vector.broadcast %29 : vector<1x64xf32> to vector<8x64xf32>
    %31 = arith.mulf %15, %30 : vector<8x64xf32>
    %cst_18 = arith.constant dense<0.000000e+00> : vector<8xf32>
    %32 = vector.multi_reduction <add>, %31, %cst_18 [1] : vector<8x64xf32> to vector<8xf32>
    %33 = vector.shape_cast %32 : vector<8xf32> to vector<8x1xf32>
    %c5 = arith.constant 5 : index
    %c0_19 = arith.constant 0 : index
    %34 = vector.load %arg3[%c5, %c0_19] : memref<8x512xf32, #tpu.memory_space<vmem>>, vector<1x1xf32>
    %35 = vector.broadcast %34 : vector<1x1xf32> to vector<8x1xf32>
    %36 = arith.addf %33, %35 : vector<8x1xf32>
    %37 = arith.negf %36 : vector<8x1xf32>
    %38 = math.exp %37 : vector<8x1xf32>
    %cst_20 = arith.constant 1.000000e+00 : f32
    %39 = vector.broadcast %cst_20 : f32 to vector<8x1xf32>
    %40 = arith.addf %39, %38 : vector<8x1xf32>
    %41 = arith.divf %39, %40 : vector<8x1xf32>
    %42 = arith.addf %28, %41 : vector<8x1xf32>
    %43 = tpu.reciprocal %42 {approx = true} : vector<8x1xf32> -> vector<8x1xf32>
    %44 = arith.mulf %28, %43 : vector<8x1xf32>
    %45 = arith.mulf %41, %43 : vector<8x1xf32>
    %46 = vector.broadcast %44 : vector<8x1xf32> to vector<8x64xf32>
    %47 = arith.mulf %7, %46 : vector<8x64xf32>
    %48 = arith.truncf %47 : vector<8x64xf32> to vector<8x64xbf16>
    %c0_21 = arith.constant 0 : index
    %c0_22 = arith.constant 0 : index
    %49 = vector.load %arg6[%c0_21, %c0_22] : memref<64x512xbf16, #tpu.memory_space<vmem>>, vector<64x512xbf16>
    %cst_23 = arith.constant dense<0.000000e+00> : vector<8x512xf32>
    %50 = tpu.matmul %48, %49, %cst_23 {dimension_numbers = #tpu.dot_dimension_numbers<[1], [0], [0], [1], [0, 0, 1, 1], [], []>} : vector<8x64xbf16>, vector<64x512xbf16>, vector<8x512xf32> -> vector<8x512xf32>
    %51 = vector.broadcast %45 : vector<8x1xf32> to vector<8x64xf32>
    %52 = arith.mulf %15, %51 : vector<8x64xf32>
    %53 = arith.truncf %52 : vector<8x64xf32> to vector<8x64xbf16>
    %c0_24 = arith.constant 0 : index
    %c0_25 = arith.constant 0 : index
    %54 = vector.load %arg7[%c0_24, %c0_25] : memref<64x512xbf16, #tpu.memory_space<vmem>>, vector<64x512xbf16>
    %cst_26 = arith.constant dense<0.000000e+00> : vector<8x512xf32>
    %55 = tpu.matmul %53, %54, %cst_26 {dimension_numbers = #tpu.dot_dimension_numbers<[1], [0], [0], [1], [0, 0, 1, 1], [], []>} : vector<8x64xbf16>, vector<64x512xbf16>, vector<8x512xf32> -> vector<8x512xf32>
    %56 = arith.addf %50, %55 : vector<8x512xf32>
    %c7 = arith.constant 7 : index
    %c0_27 = arith.constant 0 : index
    %57 = vector.load %arg3[%c7, %c0_27] : memref<8x512xf32, #tpu.memory_space<vmem>>, vector<1x512xf32>
    %58 = vector.broadcast %57 : vector<1x512xf32> to vector<8x512xf32>
    %59 = arith.addf %56, %58 : vector<8x512xf32>
    %cst_28 = arith.constant 0.000000e+00 : f32
    %60 = vector.broadcast %cst_28 : f32 to vector<8x512xf32>
    %61 = arith.maximumf %59, %60 : vector<8x512xf32>
    %62 = arith.truncf %61 : vector<8x512xf32> to vector<8x512xbf16>
    %c0_29 = arith.constant 0 : index
    %c0_30 = arith.constant 0 : index
    %63 = vector.load %arg8[%c0_29, %c0_30] : memref<512x10xbf16, #tpu.memory_space<vmem>>, vector<512x10xbf16>
    %cst_31 = arith.constant dense<0.000000e+00> : vector<8x10xf32>
    %64 = tpu.matmul %62, %63, %cst_31 {dimension_numbers = #tpu.dot_dimension_numbers<[1], [0], [0], [1], [0, 0, 1, 1], [], []>} : vector<8x512xbf16>, vector<512x10xbf16>, vector<8x10xf32> -> vector<8x10xf32>
    %c6 = arith.constant 6 : index
    %c0_32 = arith.constant 0 : index
    %65 = vector.load %arg3[%c6, %c0_32] : memref<8x512xf32, #tpu.memory_space<vmem>>, vector<1x10xf32>
    %66 = vector.broadcast %65 : vector<1x10xf32> to vector<8x10xf32>
    %67 = arith.addf %64, %66 : vector<8x10xf32>
    %c0_33 = arith.constant 0 : index
    %c0_34 = arith.constant 0 : index
    %68 = vector.load %arg9[%c0_33, %c0_34] : memref<8x10xf32, #tpu.memory_space<vmem>>, vector<8x10xf32>
    tpu.vector_store %arg9[%c0_33, %c0_34], %67 {strides = array<i32>} : memref<8x10xf32, #tpu.memory_space<vmem>>, vector<8x10xf32>,
    return
  }
  func.func @transform_0(%arg0: i32) -> (i32, i32) {
    %c0_i32 = arith.constant 0 : i32
    %c0_i32_0 = arith.constant 0 : i32
    return %arg0, %c0_i32 : i32, i32
  }
  func.func @transform_1(%arg0: i32) -> (i32, i32) {
    %c0_i32 = arith.constant 0 : i32
    %c0_i32_0 = arith.constant 0 : i32
    return %arg0, %c0_i32 : i32, i32
  }
  func.func @transform_2(%arg0: i32) -> (i32, i32) {
    %c0_i32 = arith.constant 0 : i32
    %c0_i32_0 = arith.constant 0 : i32
    %c0_i32_1 = arith.constant 0 : i32
    return %c0_i32, %c0_i32_0 : i32, i32
  }
  func.func @transform_3(%arg0: i32) -> (i32, i32) {
    %c0_i32 = arith.constant 0 : i32
    %c0_i32_0 = arith.constant 0 : i32
    %c0_i32_1 = arith.constant 0 : i32
    return %c0_i32, %c0_i32_0 : i32, i32
  }
  func.func @transform_4(%arg0: i32) -> (i32, i32) {
    %c0_i32 = arith.constant 0 : i32
    %c0_i32_0 = arith.constant 0 : i32
    %c0_i32_1 = arith.constant 0 : i32
    return %c0_i32, %c0_i32_0 : i32, i32
  }
  func.func @transform_5(%arg0: i32) -> (i32, i32) {
    %c0_i32 = arith.constant 0 : i32
    %c0_i32_0 = arith.constant 0 : i32
    %c0_i32_1 = arith.constant 0 : i32
    return %c0_i32, %c0_i32_0 : i32, i32
  }
  func.func @transform_6(%arg0: i32) -> (i32, i32) {
    %c0_i32 = arith.constant 0 : i32
    %c0_i32_0 = arith.constant 0 : i32
    %c0_i32_1 = arith.constant 0 : i32
    return %c0_i32, %c0_i32_0 : i32, i32
  }
  func.func @transform_7(%arg0: i32) -> (i32, i32) {
    %c0_i32 = arith.constant 0 : i32
    %c0_i32_0 = arith.constant 0 : i32
    %c0_i32_1 = arith.constant 0 : i32
    return %c0_i32, %c0_i32_0 : i32, i32
  }
  func.func @transform_8(%arg0: i32) -> (i32, i32) {
    %c0_i32 = arith.constant 0 : i32
    %c0_i32_0 = arith.constant 0 : i32
    return %arg0, %c0_i32 : i32, i32
  }
}

</mosaic_0001>

<bundles_post_ra>
// kernel: tpu_custom_call.1
= control target key start
LH: loop header
LB: loop body
LE: loop exit
PB: predicated region body
PF: predicated region fallthrough
CT: control target
= control target key end

     0   :  { %vm49_vm0 = vcmask 261120   ;;  %s2779_s0 = inlined_call_operand.vmem [shape: bf16[8,32], index: 0, kind: input, shape index: {}]   ;;  %s2780_s1 = inlined_call_operand.vmem [shape: bf16[8,1024], index: 1, kind: input, shape index: {}]   ;;  %s2781_s2 = inlined_call_operand.vmem [shape: f32[8,512], index: 2, kind: input, shape index: {}]   ;;  %s2782_s3 = inlined_call_operand.vmem [shape: bf16[32,64], index: 3, kind: input, shape index: {}]   ;;  %s2783_s4 = inlined_call_operand.vmem [shape: bf16[1024,64], index: 4, kind: input, shape index: {}]   ;;  %s2784_s5 = inlined_call_operand.vmem [shape: bf16[64,512], index: 5, kind: input, shape index: {}]   ;;  %s2785_s6 = inlined_call_operand.vmem [shape: bf16[64,512], index: 6, kind: input, shape index: {}]   ;;  %s2786_s7 = inlined_call_operand.vmem [shape: bf16[512,10], index: 7, kind: input, shape index: {}]   ;;  %s2787_s8 = inlined_call_operand.hbm [shape: f32[8,10], index: 8, kind: output, shape index: {}]  }
   0x1   :  { %v1973_v0 = vld [vmem:[%s2782_s3 + $0x8] sm:$0xff]  ;;  %v1981_v1 = vld [vmem:[%s2783_s4 + $0x38] sm:$0xff]  ;;  %v1972_v4 = vld [vmem:[%s2782_s3] sm:$0xff] }
   0x2   :  { %v1989_v2 = vld [vmem:[%s2783_s4 + $0x78] sm:$0xff]  ;;  %59 = vmatpush.bf16.msra.mxu0 %v1973_v0  ;;  %612 = vmatpush.bf16.msra.mxu1 %v1981_v1  ;;  %v1980_v5 = vld [vmem:[%s2783_s4 + $0x30] sm:$0xff]  ;;  %v1979_v9 = vld [vmem:[%s2783_s4 + $0x28] sm:$0xff] }
   0x3   :  { %v1997_v3 = vld [vmem:[%s2783_s4 + $0xb8] sm:$0xff]  ;;  %625 = vmatpush.bf16.msra.mxu2 %v1989_v2  ;;  %v1988_v6 = vld [vmem:[%s2783_s4 + $0x70] sm:$0xff]  ;;  %v1987_v10 = vld [vmem:[%s2783_s4 + $0x68] sm:$0xff] }
   0x4   :  { %638 = vmatpush.bf16.msra.mxu3 %v1997_v3  ;;  %v1996_v7 = vld [vmem:[%s2783_s4 + $0xb0] sm:$0xff]  ;;  %v2005_v8 = vld [vmem:[%s2783_s4 + $0xf8] sm:$0xff]  ;;  %v1995_v11 = vld [vmem:[%s2783_s4 + $0xa8] sm:$0xff] }
   0x5   :  { %v2004_v12 = vld [vmem:[%s2783_s4 + $0xf0] sm:$0xff]  ;;  %v31_v13 = vld [vmem:[%s2779_s0] sm:$0xf]  ;;  %v2003_v17 = vld [vmem:[%s2783_s4 + $0xe8] sm:$0xff] }
   0x6   :  { %60 = vmatpush.bf16.msra.mxu0 %v1972_v4  ;;  %613 = vmatpush.bf16.msra.mxu1 %v1980_v5  ;;  %v1978_v14 = vld [vmem:[%s2783_s4 + $0x20] sm:$0xff]  ;;  %v1977_v18 = vld [vmem:[%s2783_s4 + $0x18] sm:$0xff]  ;;  %v1976_v22 = vld [vmem:[%s2783_s4 + $0x10] sm:$0xff] }
   0x7   :  { %626 = vmatpush.bf16.msra.mxu2 %v1988_v6  ;;  %v1986_v15 = vld [vmem:[%s2783_s4 + $0x60] sm:$0xff]  ;;  %v1985_v19 = vld [vmem:[%s2783_s4 + $0x58] sm:$0xff]  ;;  %v1984_v23 = vld [vmem:[%s2783_s4 + $0x50] sm:$0xff] }
   0x8   :  { %639 = vmatpush.bf16.msra.mxu3 %v1996_v7  ;;  %v1994_v16 = vld [vmem:[%s2783_s4 + $0xa0] sm:$0xff]  ;;  %v1993_v20 = vld [vmem:[%s2783_s4 + $0x98] sm:$0xff]  ;;  %v1992_v24 = vld [vmem:[%s2783_s4 + $0x90] sm:$0xff] }
   0x9   :  { %1448 = vmatmul.msk.bf16.vlgmr.msra.gmra.mxu0 %vm49_vm0, %v31_v13  ;;  %v2002_v21 = vld [vmem:[%s2783_s4 + $0xe0] sm:$0xff] }
   0xa   :  { %651 = vmatpush.bf16.msrb.mxu0 %v2005_v8  ;;  %614 = vmatpush.bf16.msra.mxu1 %v1979_v9 }
   0xb   :  { %627 = vmatpush.bf16.msra.mxu2 %v1987_v10 }
   0xc   :  { %640 = vmatpush.bf16.msra.mxu3 %v1995_v11 }
   0xe   :  { %652 = vmatpush.bf16.msrb.mxu0 %v2004_v12  ;;  %615 = vmatpush.bf16.msra.mxu1 %v1978_v14 }
   0xf   :  { %628 = vmatpush.bf16.msra.mxu2 %v1986_v15 }
  0x10   :  { %641 = vmatpush.bf16.msra.mxu3 %v1994_v16 }
  0x12   :  { %653 = vmatpush.bf16.msrb.mxu0 %v2003_v17  ;;  %616 = vmatpush.bf16.msra.mxu1 %v1977_v18 }
  0x13   :  { %629 = vmatpush.bf16.msra.mxu2 %v1985_v19 }
  0x14   :  { %642 = vmatpush.bf16.msra.mxu3 %v1993_v20 }
  0x15   :  { %13 = vsyncpa [#allocation3], 0  ;;  %v2001_v25 = vld [vmem:[%s2783_s4 + $0xd8] sm:$0xff]  ;;  %v1975_v26 = vld [vmem:[%s2783_s4 + $0x8] sm:$0xff]  ;;  %vm719_vm1 = vcmask 523264   ;;  %s2143_s18 = smov [#allocation2]  }
  0x16   :  { %654 = vmatpush.bf16.msrb.mxu0 %v2002_v21  ;;  %617 = vmatpush.bf16.msra.mxu1 %v1976_v22  ;;  %v1983_v27 = vld [vmem:[%s2783_s4 + $0x48] sm:$0xff]  ;;  %v67_v29 = vld [vmem:[%s2780_s1] sm:$0xff]  ;;  %v2000_v31 = vld [vmem:[%s2783_s4 + $0xd0] sm:$0xff]  ;;  %s1429_s19 = sshll.u32 %s2143_s18, 4  ;;  %s1431_s21 = sshll.u32 %s2787_s8, 4  ;;  %vm1422_vm10 = vcmask 80896   ;;  %s1430_s19 = int_to_ptr.vmem [resolvable:$true] %s1429_s19  ;;  %s1432_s21 = int_to_ptr.hbm [resolvable:$true] %s1431_s21 }
  0x17   :  { %630 = vmatpush.bf16.msra.mxu2 %v1984_v23  ;;  %v1991_v28 = vld [vmem:[%s2783_s4 + $0x88] sm:$0xff]  ;;  %v1974_v32 = vld [vmem:[%s2783_s4] sm:$0xff]  ;;  %v205_v33 = vunpack.c.h.b16 %v67_v29  ;;  %v204_v37 = vunpack.c.l.b16 %v67_v29  ;;  %v2013_v39 = vld [vmem:[%s2783_s4 + $0x138] sm:$0xff] }
  0x18   :  { %643 = vmatpush.bf16.msra.mxu3 %v1992_v24  ;;  %v68_v30 = vld [vmem:[%s2780_s1 + $0x8] sm:$0xff]  ;;  %v1982_v35 = vld [vmem:[%s2783_s4 + $0x40] sm:$0xff]  ;;  %v2021_v40 = vld [vmem:[%s2783_s4 + $0x178] sm:$0xff] }
  0x19   :  { %v206_v34 = vunpack.c.l.b16 %v68_v30  ;;  %v1990_v36 = vld [vmem:[%s2783_s4 + $0x80] sm:$0xff]  ;;  %v1999_v38 = vld [vmem:[%s2783_s4 + $0xc8] sm:$0xff]  ;;  %v2029_v41 = vld [vmem:[%s2783_s4 + $0x1b8] sm:$0xff]  ;;  %v213_v42 = vpack.c.b16 %v205_v33, %v205_v33  ;;  %v207_v44 = vunpack.c.h.b16 %v68_v30  ;;  %v212_v45 = vpack.c.b16 %v204_v37, %v204_v37 }
  0x1a   :  { %655 = vmatpush.bf16.msrb.mxu0 %v2001_v25  ;;  %618 = vmatpush.bf16.msra.mxu1 %v1975_v26  ;;  %v1998_v46 = vld [vmem:[%s2783_s4 + $0xc0] sm:$0xff]  ;;  %v2012_v47 = vld [vmem:[%s2783_s4 + $0x130] sm:$0xff]  ;;  %v2037_v50 = vld [vmem:[%s2783_s4 + $0x1f8] sm:$0xff] }
  0x1b   :  { %631 = vmatpush.bf16.msra.mxu2 %v1983_v27  ;;  %v214_v43 = vpack.c.b16 %v206_v34, %v206_v34  ;;  %v2020_v48 = vld [vmem:[%s2783_s4 + $0x170] sm:$0xff]  ;;  %v215_v51 = vpack.c.b16 %v207_v44, %v207_v44  ;;  %v2011_v52 = vld [vmem:[%s2783_s4 + $0x128] sm:$0xff]  ;;  %v2010_v56 = vld [vmem:[%s2783_s4 + $0x120] sm:$0xff] }
  0x1c   :  { %644 = vmatpush.bf16.msra.mxu3 %v1991_v28  ;;  %v2028_v49 = vld [vmem:[%s2783_s4 + $0x1b0] sm:$0xff]  ;;  %v2019_v53 = vld [vmem:[%s2783_s4 + $0x168] sm:$0xff]  ;;  %v2018_v57 = vld [vmem:[%s2783_s4 + $0x160] sm:$0xff] }
  0x1d   :  { %v2027_v54 = vld [vmem:[%s2783_s4 + $0x1a8] sm:$0xff]  ;;  %v2036_v55 = vld [vmem:[%s2783_s4 + $0x1f0] sm:$0xff]  ;;  %v2026_v58 = vld [vmem:[%s2783_s4 + $0x1a0] sm:$0xff] }
  0x1e   :  { %656 = vmatpush.bf16.msrb.mxu0 %v2000_v31  ;;  %619 = vmatpush.bf16.msra.mxu1 %v1974_v32  ;;  %v2035_v59 = vld [vmem:[%s2783_s4 + $0x1e8] sm:$0xff]  ;;  %v2009_v60 = vld [vmem:[%s2783_s4 + $0x118] sm:$0xff]  ;;  %v2034_v63 = vld [vmem:[%s2783_s4 + $0x1e0] sm:$0xff] }
  0x1f   :  { %632 = vmatpush.bf16.msra.mxu2 %v1982_v35  ;;  %v2017_v61 = vld [vmem:[%s2783_s4 + $0x158] sm:$0xff]  ;;  %v2008_v0 = vld [vmem:[%s2783_s4 + $0x110] sm:$0xff]  ;;  %v2007_v4 = vld [vmem:[%s2783_s4 + $0x108] sm:$0xff] }
  0x20   :  { %645 = vmatpush.bf16.msra.mxu3 %v1990_v36  ;;  %v2025_v62 = vld [vmem:[%s2783_s4 + $0x198] sm:$0xff]  ;;  %v2016_v1 = vld [vmem:[%s2783_s4 + $0x150] sm:$0xff]  ;;  %v2015_v6 = vld [vmem:[%s2783_s4 + $0x148] sm:$0xff] }
  0x21   :  { %620 = vmatmul.bf16.vlgmr.msra.gmra.mxu1 %v212_v45  ;;  %v2024_v2 = vld [vmem:[%s2783_s4 + $0x190] sm:$0xff]  ;;  %v2033_v3 = vld [vmem:[%s2783_s4 + $0x1d8] sm:$0xff]  ;;  %v2023_v7 = vld [vmem:[%s2783_s4 + $0x188] sm:$0xff] }
  0x22   :  { %657 = vmatpush.bf16.msrb.mxu0 %v1999_v38  ;;  %664 = vmatpush.bf16.msrb.mxu1 %v2013_v39  ;;  %v69_v5 = vld [vmem:[%s2780_s1 + $0x10] sm:$0xff]  ;;  %v70_v8 = vld [vmem:[%s2780_s1 + $0x18] sm:$0xff]  ;;  %v2006_v11 = vld [vmem:[%s2783_s4 + $0x100] sm:$0xff] }
  0x23   :  { %677 = vmatpush.bf16.msrb.mxu2 %v2021_v40  ;;  %646 = vmatmul.bf16.vlgmr.msra.gmra.mxu3 %v214_v43  ;;  %v2032_v9 = vld [vmem:[%s2783_s4 + $0x1d0] sm:$0xff]  ;;  %v208_v10 = vunpack.c.l.b16 %v69_v5  ;;  %v209_v12 = vunpack.c.h.b16 %v69_v5  ;;  %v210_v13 = vunpack.c.l.b16 %v70_v8  ;;  %v2014_v14 = vld [vmem:[%s2783_s4 + $0x140] sm:$0xff]  ;;  %v2031_v16 = vld [vmem:[%s2783_s4 + $0x1c8] sm:$0xff]  ;;  %v211_v20 = vunpack.c.h.b16 %v70_v8 }
  0x24   :  { %690 = vmatpush.bf16.msrb.mxu3 %v2029_v41  ;;  %633 = vmatmul.bf16.vlgmr.msra.gmra.mxu2 %v213_v42  ;;  %v2022_v15 = vld [vmem:[%s2783_s4 + $0x180] sm:$0xff] }
  0x25   :  { %v216_v17 = vpack.c.b16 %v208_v10, %v208_v10  ;;  %v217_v18 = vpack.c.b16 %v209_v12, %v209_v12  ;;  %v218_v19 = vpack.c.b16 %v210_v13, %v210_v13  ;;  %v2030_v21 = vld [vmem:[%s2783_s4 + $0x1c0] sm:$0xff]  ;;  %v219_v22 = vpack.c.b16 %v211_v20, %v211_v20 }
  0x26   :  { %658 = vmatpush.bf16.msrb.mxu0 %v1998_v46  ;;  %665 = vmatpush.bf16.msrb.mxu1 %v2012_v47  ;;  %v36_v23 = vld [vmem:[%s2781_s2] ss:$0 sm:$0xff]  ;;  %v717_v26 = vld [vmem:[%s2781_s2 + $0x2] ss:$0 sm:$0xff]  ;;  %v199_v39 = vld [vmem:[%s2781_s2 + $0x1] ss:$0 sm:$0xff] }
  0x27   :  { %678 = vmatpush.bf16.msrb.mxu2 %v2020_v48  ;;  %v1757_v20 = vld [vmem:[%s2785_s6 + $0x60] sm:$0xf] }
  0x28   :  { %691 = vmatpush.bf16.msrb.mxu3 %v2028_v49 }
  0x29   :  { %659 = vmatmul.bf16.vlgmr.msrb.gmra.mxu0 %v215_v51 }
  0x2a   :  { %703 = vmatpush.bf16.msra.mxu0 %v2037_v50  ;;  %666 = vmatpush.bf16.msrb.mxu1 %v2011_v52 }
  0x2b   :  { %679 = vmatpush.bf16.msrb.mxu2 %v2019_v53  ;;  %v744_v53 = vld [vmem:[%s2781_s2 + $0x3] ss:$0 sm:$0xff] }
  0x2c   :  { %692 = vmatpush.bf16.msrb.mxu3 %v2027_v54 }
  0x2e   :  { %704 = vmatpush.bf16.msra.mxu0 %v2036_v55  ;;  %667 = vmatpush.bf16.msrb.mxu1 %v2010_v56 }
  0x2f   :  { %680 = vmatpush.bf16.msrb.mxu2 %v2018_v57 }
  0x30   :  { %693 = vmatpush.bf16.msrb.mxu3 %v2026_v58 }
  0x32   :  { %705 = vmatpush.bf16.msra.mxu0 %v2035_v59  ;;  %668 = vmatpush.bf16.msrb.mxu1 %v2009_v60  ;;  %v723_v60 = vld [vmem:[%s2781_s2 + $0x4] ss:$0 sm:$0xff] }
  0x33   :  { %681 = vmatpush.bf16.msrb.mxu2 %v2017_v61 }
  0x34   :  { %694 = vmatpush.bf16.msrb.mxu3 %v2025_v62 }
  0x36   :  { %706 = vmatpush.bf16.msra.mxu0 %v2034_v63  ;;  %669 = vmatpush.bf16.msrb.mxu1 %v2008_v0  ;;  %v2142_v63 = vmov 0  }
  0x37   :  { %682 = vmatpush.bf16.msrb.mxu2 %v2016_v1  ;;  %2104 = vset.pattern.permute.xlu1 %v2142_v63 }
  0x38   :  { %695 = vmatpush.bf16.msrb.mxu3 %v2024_v2  ;;  %2105 = vset.pattern.permute.xlu0 %v2142_v63  ;;  %v1735_v63 = vld [vmem:[%s2785_s6 + $0x38] sm:$0xf0] }
  0x3a   :  { %707 = vmatpush.bf16.msra.mxu0 %v2033_v3  ;;  %670 = vmatpush.bf16.msrb.mxu1 %v2007_v4  ;;  %v749_v3 = vld [vmem:[%s2781_s2 + $0x5] ss:$0 sm:$0xff] }
  0x3b   :  { %683 = vmatpush.bf16.msrb.mxu2 %v2015_v6 }
  0x3c   :  { %696 = vmatpush.bf16.msrb.mxu3 %v2023_v7 }
  0x3e   :  { %708 = vmatpush.bf16.msra.mxu0 %v2032_v9  ;;  %671 = vmatpush.bf16.msrb.mxu1 %v2006_v11 }
  0x3f   :  { %684 = vmatpush.bf16.msrb.mxu2 %v2014_v14  ;;  %v2066_v14 = vld [vmem:[%s2785_s6 + $0x64] sm:$0xf] }
  0x40   :  { %697 = vmatpush.bf16.msrb.mxu3 %v2022_v15  ;;  %v1759_v15 = vld [vmem:[%s2785_s6 + $0x70] sm:$0xf0] }
  0x41   :  { %672 = vmatmul.bf16.vlgmr.msrb.gmra.mxu1 %v216_v17 }
  0x42   :  { %709 = vmatpush.bf16.msra.mxu0 %v2031_v16  ;;  %685 = vmatmul.bf16.vlgmr.msrb.gmra.mxu2 %v217_v18  ;;  %v1765_v16 = vld [vmem:[%s2785_s6 + $0x68] sm:$0xf]  ;;  %v1762_v18 = vor.u32 %v2066_v14, %v1759_v15  ;;  %v2057_v15 = vld [vmem:[%s2785_s6 + $0x14] sm:$0xf0] }
  0x43   :  { %698 = vmatmul.bf16.vlgmr.msrb.gmra.mxu3 %v218_v19  ;;  %v2069_v19 = vld [vmem:[%s2785_s6 + $0x74] sm:$0xf0] }
  0x44   :  { %920 = vmatpush.bf16.msra.mxu2 %v1762_v18 }
  0x46   :  { %710 = vmatpush.bf16.msra.mxu0 %v2030_v21  ;;  %v2068_v21 = vld [vmem:[%s2785_s6 + $0x6c] sm:$0xf0] }
  0x49   :  { %711 = vmatmul.bf16.vlgmr.msra.gmra.mxu0 %v219_v22 }
  0x86   :  { %v62_v24 = vpop.f32.mrf.mxu0 }
  0x87   :  { %v2405_v25 = vadd.f32 %v62_v24, %v36_v23  ;;  %v1766_v23 = vor.u32 %v2069_v19, %v1765_v16  ;;  %v1758_v24 = vor.u32 %v2068_v21, %v1757_v20  ;;  %v1709_v16 = vld [vmem:[%s2785_s6] sm:$0xf]  ;;  %v2055_v20 = vld [vmem:[%s2785_s6 + $0xc] sm:$0xf]  ;;  %v1719_v21 = vld [vmem:[%s2785_s6 + $0x18] sm:$0xf0] }
  0x89   :  { %v66_v27 = vmax.f32 %v2405_v25, 0.0  ;;  %933 = vmatpush.bf16.msra.mxu3 %v1766_v23  ;;  %907 = vmatpush.bf16.msra.mxu1 %v1758_v24  ;;  %v2050_v23 = vld [vmem:[%s2784_s5 + $0x64] sm:$0xf]  ;;  %v1827_v24 = vld [vmem:[%s2784_s5 + $0x70] sm:$0xf0]  ;;  %v2075_v25 = vld [vmem:[%s2786_s7 + $0x28] sm:$0xff] }
  0x8b   :  { %v718_v28 = vmul.f32 %v717_v26, %v66_v27  ;;  %v2067_v26 = vld [vmem:[%s2785_s6 + $0x6c] sm:$0xf] }
  0x8d   :  { %v720_v29 = vsel %vm719_vm1, %v718_v28, 0.0  ;;  %v1767_v28 = vld [vmem:[%s2785_s6 + $0x78] sm:$0xf0] }
  0x8e   :  { %721 = vadd.xlane.f32.xlu0 %v720_v29  ;;  %v64_v30 = vpop.f32.mrf.mxu0  ;;  %v2062_v29 = vld [vmem:[%s2785_s6 + $0x44] sm:$0xf] }
  0x9e   :  { %v621_v31 = vpop.f32.mrf.mxu1 }
  0x9f   :  { %v622_v40 = vadd.f32 %v621_v31, %v199_v39  ;;  %v1770_v31 = vor.u32 %v2067_v26, %v1767_v28  ;;  %v2064_v39 = vld [vmem:[%s2785_s6 + $0x4c] sm:$0xf0]  ;;  %v1833_v26 = vld [vmem:[%s2784_s5 + $0x68] sm:$0xf]  ;;  %v1830_v28 = vor.u32 %v2050_v23, %v1827_v24  ;;  %v2074_v23 = vld [vmem:[%s2786_s7 + $0x20] sm:$0xff] }
  0xa0   :  { %v2098_v24 = vld [vmem:[%s2786_s7 + $0xe0] sm:$0xff] }
  0xa1   :  { %946 = vmatpush.bf16.msrb.mxu0 %v1770_v31  ;;  %v2052_v31 = vld [vmem:[%s2784_s5 + $0x6c] sm:$0xf0] }
  0xa6   :  { %v660_v32 = vpop.f32.mrf.mxu0  ;;  %v647_v34 = vpop.f32.mrf.mxu3 }
  0xa7   :  { %v634_v33 = vpop.f32.mrf.mxu2  ;;  %v623_v35 = vpop.f32.mrf.mxu1 }
  0xa8   :  { %v635_v41 = vadd.f32 %v634_v33, %v622_v40  ;;  %v1749_v33 = vld [vmem:[%s2785_s6 + $0x48] sm:$0xf] }
  0xaa   :  { %v648_v42 = vadd.f32 %v647_v34, %v635_v41  ;;  %v2065_v34 = vld [vmem:[%s2785_s6 + $0x54] sm:$0xf0] }
  0xab   :  { %v2049_v41 = vld [vmem:[%s2784_s5 + $0x54] sm:$0xf0] }
  0xac   :  { %v661_v44 = vadd.f32 %v660_v32, %v648_v42  ;;  %v1743_v32 = vld [vmem:[%s2785_s6 + $0x50] sm:$0xf0] }
  0xae   :  { %v662_v36 = vpop.f32.mrf.mxu0  ;;  %v649_v38 = vpop.f32.mrf.mxu3 }
  0xaf   :  { %v636_v37 = vpop.f32.mrf.mxu2  ;;  %v1746_v36 = vor.u32 %v2062_v29, %v1743_v32  ;;  %v1741_v38 = vld [vmem:[%s2785_s6 + $0x40] sm:$0xf]  ;;  %v2053_v29 = vld [vmem:[%s2784_s5 + $0x74] sm:$0xf0] }
  0xb0   :  { %v1750_v37 = vor.u32 %v2065_v34, %v1749_v33  ;;  %v1834_v32 = vor.u32 %v2053_v29, %v1833_v26  ;;  %v2051_v34 = vld [vmem:[%s2784_s5 + $0x6c] sm:$0xf]  ;;  %v2073_v29 = vld [vmem:[%s2786_s7 + $0x18] sm:$0xff] }
  0xb1   :  { %921 = vmatpush.bf16.msra.mxu2 %v1746_v36  ;;  %v2083_v26 = vld [vmem:[%s2786_s7 + $0x68] sm:$0xff] }
  0xb2   :  { %934 = vmatpush.bf16.msra.mxu3 %v1750_v37  ;;  %v2046_v37 = vld [vmem:[%s2784_s5 + $0x44] sm:$0xf] }
  0xbe   :  { %v673_v43 = vpop.f32.mrf.mxu1 }
  0xbf   :  { %v674_v45 = vadd.f32 %v673_v43, %v661_v44  ;;  %v1742_v44 = vor.u32 %v2064_v39, %v1741_v38  ;;  %v1811_v38 = vld [vmem:[%s2784_s5 + $0x50] sm:$0xf0]  ;;  %v1817_v39 = vld [vmem:[%s2784_s5 + $0x48] sm:$0xf] }
  0xc1   :  { %908 = vmatpush.bf16.msra.mxu1 %v1742_v44  ;;  %v1818_v44 = vor.u32 %v2049_v41, %v1817_v39  ;;  %v2080_v39 = vld [vmem:[%s2786_s7 + $0x50] sm:$0xff]  ;;  %v2070_v41 = vld [vmem:[%s2786_s7] sm:$0xff] }
  0xc5   :  { %v686_v47 = vpop.f32.mrf.mxu2 }
  0xc6   :  { %v712_v46 = vpop.f32.mrf.mxu0  ;;  %v699_v48 = vpop.f32.mrf.mxu3  ;;  %v687_v49 = vadd.f32 %v686_v47, %v674_v45  ;;  %v2063_v45 = vld [vmem:[%s2785_s6 + $0x4c] sm:$0xf] }
  0xc7   :  { %v675_v50 = vpop.f32.mrf.mxu1 }
  0xc8   :  { %v700_v51 = vadd.f32 %v699_v48, %v687_v49  ;;  %v2058_v48 = vld [vmem:[%s2785_s6 + $0x24] sm:$0xf]  ;;  %v1727_v49 = vld [vmem:[%s2785_s6 + $0x30] sm:$0xf0]  ;;  %v1733_v50 = vld [vmem:[%s2785_s6 + $0x28] sm:$0xf] }
  0xca   :  { %v2417_v52 = vadd.f32 %v712_v46, %v700_v51  ;;  %v1751_v46 = vld [vmem:[%s2785_s6 + $0x58] sm:$0xf0] }
  0xcb   :  { %v1754_v47 = vor.u32 %v2063_v45, %v1751_v46  ;;  %v2047_v46 = vld [vmem:[%s2784_s5 + $0x4c] sm:$0xf] }
  0xcc   :  { %v716_v54 = vmax.f32 %v2417_v52, 0.0  ;;  %v2076_v52 = vld [vmem:[%s2786_s7 + $0x30] sm:$0xff] }
  0xcd   :  { %v688_v56 = vpop.f32.mrf.mxu2  ;;  %947 = vmatpush.bf16.msrb.mxu0 %v1754_v47  ;;  %v1819_v47 = vld [vmem:[%s2784_s5 + $0x58] sm:$0xf0] }
  0xce   :  { %v714_v55 = vpop.f32.mrf.mxu0  ;;  %v701_v57 = vpop.f32.mrf.mxu3  ;;  %v745_v58 = vmul.f32 %v744_v53, %v716_v54  ;;  %v1730_v53 = vor.u32 %v2058_v48, %v1727_v49  ;;  %v1725_v56 = vld [vmem:[%s2785_s6 + $0x20] sm:$0xf]  ;;  %v1822_v48 = vor.u32 %v2047_v46, %v1819_v47  ;;  %v2042_v49 = vld [vmem:[%s2784_s5 + $0x24] sm:$0xf] }
  0xcf   :  { %v2061_v55 = vld [vmem:[%s2785_s6 + $0x34] sm:$0xf0]  ;;  %v2060_v57 = vld [vmem:[%s2785_s6 + $0x2c] sm:$0xf0]  ;;  %v2086_v46 = vld [vmem:[%s2786_s7 + $0x80] sm:$0xff] }
  0xd0   :  { %v746_v59 = vsel %vm719_vm1, %v745_v58, 0.0  ;;  %922 = vmatpush.bf16.msra.mxu2 %v1730_v53 }
  0xd1   :  { %747 = vadd.xlane.f32.xlu0 %v746_v59 }
 0x101   :  { %v722_v61 = vpop.xlane.xlu0 %721 }
 0x102   :  { %v724_v62 = vadd.f32 %v723_v60, %v722_v61  ;;  %v1734_v60 = vor.u32 %v2061_v55, %v1733_v50  ;;  %v1726_v61 = vor.u32 %v2060_v57, %v1725_v56  ;;  %v1795_v50 = vld [vmem:[%s2784_s5 + $0x30] sm:$0xf0]  ;;  %v2045_v55 = vld [vmem:[%s2784_s5 + $0x34] sm:$0xf0]  ;;  %v1793_v56 = vld [vmem:[%s2784_s5 + $0x20] sm:$0xf] }
 0x103   :  { %v1798_v53 = vor.u32 %v2042_v49, %v1795_v50  ;;  %v2044_v57 = vld [vmem:[%s2784_s5 + $0x2c] sm:$0xf0] }
 0x104   :  { %v1705_v0 = vmul.f32 -1.442695, %v724_v62  ;;  %v2059_v62 = vld [vmem:[%s2785_s6 + $0x2c] sm:$0xf]  ;;  %935 = vmatpush.bf16.msra.mxu3 %v1734_v60  ;;  %909 = vmatpush.bf16.msra.mxu1 %v1726_v61  ;;  %v1803_v61 = vld [vmem:[%s2784_s5 + $0x38] sm:$0xf0] }
 0x105   :  { %v2043_v60 = vld [vmem:[%s2784_s5 + $0x2c] sm:$0xf] }
 0x106   :  { %2106 = vpow2.f32 %v1705_v0 }
 0x10c   :  { %v2107_v1 = vpop.eup %2106 }
 0x10d   :  { %v2429_v2 = vadd.f32 1.0, %v2107_v1 }
 0x10f   :  { %2108 = vrcp.f32 %v2429_v2  ;;  %v738_v12 = vand.u32 2147483647, %v2429_v2  ;;  %v740_v13 = vand.u32 2147483648, %v2429_v2  ;;  %vm734_vm2 = vweird.f32 %v2429_v2 }
 0x111   :  { %vm2525_vm6 = vcmp.eq.f32.partialorder %v738_v12, 8.507059e+37  ;;  %v741_v59 = vor.u32 1.1754944e-38, %v740_v13  ;;  %v1711_v12 = vld [vmem:[%s2785_s6 + $0x10] sm:$0xf0]  ;;  %v1717_v13 = vld [vmem:[%s2785_s6 + $0x8] sm:$0xf] }
 0x112   :  { %v1718_v18 = vor.u32 %v2057_v15, %v1717_v13  ;;  %v2101_v15 = vld [vmem:[%s2786_s7 + $0xf8] sm:$0xff] }
 0x114   :  { %936 = vmatpush.bf16.msra.mxu3 %v1718_v18 }
 0x115   :  { %v2435_v7 = vpop.eup %2108 }
 0x116   :  { %v730_v9 = vmul.f32 %v2435_v7, %v2429_v2  ;;  %vm735_vm3 = vweird.f32 %v2435_v7  ;;  %v1738_v2 = vor.u32 %v2059_v62, %v1735_v63  ;;  %v2038_v62 = vld [vmem:[%s2784_s5 + $0x4] sm:$0xf]  ;;  %v1806_v63 = vor.u32 %v2043_v60, %v1803_v61 }
 0x117   :  { %vm2496_vm4 = vmor %vm734_vm2, %vm735_vm3 }
 0x118   :  { %v731_v11 = vsub.f32 1.0, %v730_v9  ;;  %948 = vmatpush.bf16.msrb.mxu0 %v1738_v2  ;;  %1068 = vmatpush.bf16.msrb.mxu3 %v1834_v32  ;;  %v2041_v2 = vld [vmem:[%s2784_s5 + $0x14] sm:$0xf0]  ;;  %v2090_v32 = vld [vmem:[%s2786_s7 + $0xa0] sm:$0xff] }
 0x11a   :  { %v732_v17 = vmul.f32 %v2435_v7, %v731_v11  ;;  %v2054_v11 = vld [vmem:[%s2785_s6 + $0x4] sm:$0xf] }
 0x11b   :  { %v1714_v14 = vor.u32 %v2054_v11, %v1711_v12 }
 0x11c   :  { %v733_v40 = vadd.f32 %v2435_v7, %v732_v17  ;;  %v2056_v17 = vld [vmem:[%s2785_s6 + $0xc] sm:$0xf0]  ;;  %1069 = vmatpush.bf16.msrb.mxu3 %v1818_v44  ;;  %v2087_v44 = vld [vmem:[%s2786_s7 + $0x88] sm:$0xff] }
 0x11d   :  { %v1710_v19 = vor.u32 %v2056_v17, %v1709_v16  ;;  %923 = vmatpush.bf16.msra.mxu2 %v1714_v14  ;;  %v2077_v14 = vld [vmem:[%s2786_s7 + $0x38] sm:$0xff] }
 0x11e   :  { %v737_v0 = vsel %vm2496_vm4, %v2435_v7, %v733_v40  ;;  %v1814_v40 = vor.u32 %v2046_v37, %v1811_v38  ;;  %v2071_v37 = vld [vmem:[%s2786_s7 + $0x8] sm:$0xff] }
 0x11f   :  { %910 = vmatpush.bf16.msra.mxu1 %v1710_v19  ;;  %v2085_v19 = vld [vmem:[%s2786_s7 + $0x78] sm:$0xff]  ;;  %v2095_v38 = vld [vmem:[%s2786_s7 + $0xc8] sm:$0xff] }
 0x121   :  { %1055 = vmatpush.bf16.msrb.mxu2 %v1830_v28  ;;  %v2091_v28 = vld [vmem:[%s2786_s7 + $0xa8] sm:$0xff] }
 0x125   :  { %1056 = vmatpush.bf16.msrb.mxu2 %v1814_v40  ;;  %v2088_v40 = vld [vmem:[%s2786_s7 + $0x90] sm:$0xff] }
 0x129   :  { %1057 = vmatpush.bf16.msrb.mxu2 %v1798_v53 }
 0x144   :  { %v748_v4 = vpop.xlane.xlu0 %747 }
 0x145   :  { %v750_v5 = vadd.f32 %v749_v3, %v748_v4 }
 0x147   :  { %v1706_v6 = vmul.f32 -1.442695, %v750_v5  ;;  %v742_v5 = vsel %vm2525_vm6, %v741_v59, %v737_v0  ;;  %v1794_v59 = vor.u32 %v2044_v57, %v1793_v56  ;;  %v1779_v0 = vld [vmem:[%s2784_s5 + $0x10] sm:$0xf0] }
 0x149   :  { %2110 = vpow2.f32 %v1706_v6 }
 0x14f   :  { %v2111_v8 = vpop.eup %2110 }
 0x150   :  { %v2439_v10 = vadd.f32 1.0, %v2111_v8 }
 0x152   :  { %2112 = vrcp.f32 %v2439_v10  ;;  %v764_v35 = vand.u32 2147483647, %v2439_v10  ;;  %v766_v43 = vand.u32 2147483648, %v2439_v10  ;;  %vm760_vm7 = vweird.f32 %v2439_v10 }
 0x154   :  { %v767_v3 = vor.u32 1.1754944e-38, %v766_v43  ;;  %vm765_vm9 = vcmp.eq.f32.partialorder %v764_v35, 8.507059e+37  ;;  %v1835_v35 = vld [vmem:[%s2784_s5 + $0x78] sm:$0xf0]  ;;  %v2048_v43 = vld [vmem:[%s2784_s5 + $0x4c] sm:$0xf0] }
 0x155   :  { %v1838_v36 = vor.u32 %v2051_v34, %v1835_v35  ;;  %v2096_v34 = vld [vmem:[%s2786_s7 + $0xd0] sm:$0xff]  ;;  %v2081_v35 = vld [vmem:[%s2786_s7 + $0x58] sm:$0xff] }
 0x158   :  { %v2113_v22 = vpop.eup %2112 }
 0x159   :  { %v756_v30 = vmul.f32 %v2113_v22, %v2439_v10  ;;  %vm761_vm5 = vweird.f32 %v2113_v22 }
 0x15a   :  { %vm762_vm8 = vmor %vm760_vm7, %vm761_vm5 }
 0x15b   :  { %v757_v42 = vsub.f32 1.0, %v756_v30  ;;  %v1825_v30 = vld [vmem:[%s2784_s5 + $0x60] sm:$0xf] }
 0x15c   :  { %v1826_v33 = vor.u32 %v2052_v31, %v1825_v30  ;;  %v2097_v30 = vld [vmem:[%s2786_s7 + $0xd8] sm:$0xff]  ;;  %v2082_v31 = vld [vmem:[%s2786_s7 + $0x60] sm:$0xff] }
 0x15d   :  { %v758_v51 = vmul.f32 %v2113_v22, %v757_v42  ;;  %v1809_v42 = vld [vmem:[%s2784_s5 + $0x40] sm:$0xf] }
 0x15e   :  { %1042 = vmatpush.bf16.msrb.mxu1 %v1826_v33  ;;  %v1810_v45 = vor.u32 %v2048_v43, %v1809_v42  ;;  %v2072_v33 = vld [vmem:[%s2786_s7 + $0x10] sm:$0xff]  ;;  %v2094_v42 = vld [vmem:[%s2786_s7 + $0xc0] sm:$0xff]  ;;  %v2079_v43 = vld [vmem:[%s2786_s7 + $0x48] sm:$0xff] }
 0x15f   :  { %v759_v1 = vadd.f32 %v2113_v22, %v758_v51  ;;  %v1801_v51 = vld [vmem:[%s2784_s5 + $0x28] sm:$0xf] }
 0x160   :  { %v1802_v58 = vor.u32 %v2045_v55, %v1801_v51  ;;  %v1843_v55 = vld [vmem:[%s2781_s2 + $0x7] ss:$8 sm:$0xf] }
 0x161   :  { %v763_v4 = vsel %vm762_vm8, %v2113_v22, %v759_v1  ;;  %v1722_v22 = vor.u32 %v2055_v20, %v1719_v21  ;;  %v1785_v1 = vld [vmem:[%s2784_s5 + $0x8] sm:$0xf]  ;;  %v2093_v20 = vld [vmem:[%s2786_s7 + $0xb8] sm:$0xff]  ;;  %v2084_v21 = vld [vmem:[%s2786_s7 + $0x70] sm:$0xff]  ;;  %v1096_v60 = vperm.slane %v1843_v55, 3 }
 0x162   :  { %v768_v6 = vsel %vm765_vm9, %v767_v3, %v763_v4  ;;  %1043 = vmatpush.bf16.msrb.mxu1 %v1810_v45  ;;  %v1782_v3 = vor.u32 %v2038_v62, %v1779_v0  ;;  %v1777_v4 = vld [vmem:[%s2784_s5] sm:$0xf]  ;;  %1070 = vmatpush.bf16.msrb.mxu3 %v1802_v58  ;;  %v1093_v58 = vperm.slane %v1843_v55, 0 }
 0x163   :  { %v770_v8 = vadd.f32 %v768_v6, %v742_v5  ;;  %949 = vmatpush.bf16.msrb.mxu0 %v1722_v22  ;;  %v2092_v22 = vld [vmem:[%s2786_s7 + $0xb0] sm:$0xff]  ;;  %v2078_v45 = vld [vmem:[%s2786_s7 + $0x40] sm:$0xff] }
 0x164   :  { %1058 = vmatpush.bf16.msrb.mxu2 %v1782_v3  ;;  %v1094_v3 = vperm.slane %v1843_v55, 1 }
 0x165   :  { %2114 = vrcp.f32 %v770_v8  ;;  %v1786_v8 = vor.u32 %v2041_v2, %v1785_v1 }
 0x166   :  { %1044 = vmatpush.bf16.msrb.mxu1 %v1794_v59 }
 0x167   :  { %1081 = vmatpush.bf16.msra.mxu0 %v1838_v36  ;;  %1071 = vmatpush.bf16.msrb.mxu3 %v1786_v8  ;;  %v2089_v36 = vld [vmem:[%s2786_s7 + $0x98] sm:$0xff] }
 0x16b   :  { %v2115_v7 = vpop.eup %2114  ;;  %1082 = vmatpush.bf16.msra.mxu0 %v1822_v48 }
 0x16c   :  { %v773_v9 = vmul.f32 %v2115_v7, %v768_v6  ;;  %v772_v10 = vmul.f32 %v2115_v7, %v742_v5  ;;  %v2040_v5 = vld [vmem:[%s2784_s5 + $0xc] sm:$0xf0]  ;;  %v2039_v6 = vld [vmem:[%s2784_s5 + $0xc] sm:$0xf] }
 0x16d   :  { %v1778_v7 = vor.u32 %v2040_v5, %v1777_v4 }
 0x16e   :  { %799 = vperm.xlu1 %2104, %v773_v9   ;;  %v1787_v9 = vld [vmem:[%s2784_s5 + $0x18] sm:$0xf0] }
 0x16f   :  { %1083 = vmatpush.bf16.msra.mxu0 %v1806_v63  ;;  %1045 = vmatpush.bf16.msrb.mxu1 %v1778_v7 }
 0x176   :  { %776 = vperm.xlu1 %2104, %v772_v10   ;;  %v1790_v10 = vor.u32 %v2039_v6, %v1787_v9  ;;  %v1095_v6 = vperm.slane %v1843_v55, 2 }
 0x178   :  { %1084 = vmatpush.bf16.msra.mxu0 %v1790_v10 }
 0x1e0   :  { %v800_v11 = vpop.permute.xlu1 %799 }
 0x1e1   :  { %v802_v12 = vmul.f32 %v800_v11, %v716_v54  ;;  %v2100_v54 = vld [vmem:[%s2786_s7 + $0xf0] sm:$0xff] }
 0x1e3   :  { %v803_v13 = vpack.c.bf16 %v802_v12, %v802_v12 }
 0x1e5   :  { %1771 = vmatmul.msk.bf16.vlgmr.msra.gmra.mxu1 %vm719_vm1, %v803_v13  ;;  %1772 = vmatmul.msk.bf16.vlgmr.msra.gmra.mxu2 %vm719_vm1, %v803_v13 }
 0x1e6   :  { %1773 = vmatmul.msk.bf16.vlgmr.msra.gmra.mxu3 %vm719_vm1, %v803_v13  ;;  %1774 = vmatmul.msk.bf16.vlgmr.msrb.gmra.mxu0 %vm719_vm1, %v803_v13 }
 0x1e7   :  { %1370 = vmatpush.bf16.msra.mxu1 %v2077_v14  ;;  %1409 = vmatpush.bf16.msrb.mxu0 %v2101_v15 }
 0x1e8   :  { %v777_v16 = vpop.permute.xlu1 %776  ;;  %1383 = vmatpush.bf16.msra.mxu2 %v2085_v19  ;;  %1396 = vmatpush.bf16.msra.mxu3 %v2093_v20 }
 0x1e9   :  { %v779_v17 = vmul.f32 %v777_v16, %v66_v27  ;;  %v2099_v27 = vld [vmem:[%s2786_s7 + $0xe8] sm:$0xff] }
 0x1eb   :  { %1371 = vmatpush.bf16.msra.mxu1 %v2076_v52  ;;  %1410 = vmatpush.bf16.msrb.mxu0 %v2100_v54  ;;  %v780_v18 = vpack.c.bf16 %v779_v17, %v779_v17 }
 0x1ec   :  { %1384 = vmatpush.bf16.msra.mxu2 %v2084_v21  ;;  %1397 = vmatpush.bf16.msra.mxu3 %v2092_v22 }
 0x1ef   :  { %1372 = vmatpush.bf16.msra.mxu1 %v2075_v25  ;;  %1411 = vmatpush.bf16.msrb.mxu0 %v2099_v27  ;;  %v1177_v27 = vld [vmem:[%s2781_s2 + $0x6] ss:$0 sm:$0xff] }
 0x1f0   :  { %1385 = vmatpush.bf16.msra.mxu2 %v2083_v26  ;;  %1398 = vmatpush.bf16.msra.mxu3 %v2091_v28 }
 0x1f3   :  { %1373 = vmatpush.bf16.msra.mxu1 %v2074_v23  ;;  %1412 = vmatpush.bf16.msrb.mxu0 %v2098_v24 }
 0x1f4   :  { %1386 = vmatpush.bf16.msra.mxu2 %v2082_v31  ;;  %1399 = vmatpush.bf16.msra.mxu3 %v2090_v32 }
 0x1f5   :  { %1839 = vmatmul.msk.bf16.vlgmr.msrb.gmra.mxu1 %vm719_vm1, %v780_v18  ;;  %1840 = vmatmul.msk.bf16.vlgmr.msrb.gmra.mxu2 %vm719_vm1, %v780_v18 }
 0x1f6   :  { %1841 = vmatmul.msk.bf16.vlgmr.msrb.gmra.mxu3 %vm719_vm1, %v780_v18  ;;  %1842 = vmatmul.msk.bf16.vlgmr.msra.gmra.mxu0 %vm719_vm1, %v780_v18 }
 0x1f7   :  { %1374 = vmatpush.bf16.msra.mxu1 %v2073_v29  ;;  %1413 = vmatpush.bf16.msrb.mxu0 %v2097_v30 }
 0x1f8   :  { %1387 = vmatpush.bf16.msra.mxu2 %v2081_v35  ;;  %1400 = vmatpush.bf16.msra.mxu3 %v2089_v36 }
 0x1fb   :  { %1375 = vmatpush.bf16.msra.mxu1 %v2072_v33  ;;  %1414 = vmatpush.bf16.msrb.mxu0 %v2096_v34 }
 0x1fc   :  { %1388 = vmatpush.bf16.msra.mxu2 %v2080_v39  ;;  %1401 = vmatpush.bf16.msra.mxu3 %v2088_v40 }
 0x1ff   :  { %1376 = vmatpush.bf16.msra.mxu1 %v2071_v37  ;;  %1415 = vmatpush.bf16.msrb.mxu0 %v2095_v38 }
 0x200   :  { %1389 = vmatpush.bf16.msra.mxu2 %v2079_v43  ;;  %1402 = vmatpush.bf16.msra.mxu3 %v2087_v44 }
 0x203   :  { %1377 = vmatpush.bf16.msra.mxu1 %v2070_v41  ;;  %1416 = vmatpush.bf16.msrb.mxu0 %v2094_v42 }
 0x204   :  { %1390 = vmatpush.bf16.msra.mxu2 %v2078_v45  ;;  %1403 = vmatpush.bf16.msra.mxu3 %v2086_v46 }
 0x262   :  { %v912_v47 = vpop.f32.mrf.mxu1 }
 0x263   :  { %v951_v48 = vpop.f32.mrf.mxu0 }
 0x268   :  { %v925_v49 = vpop.f32.mrf.mxu2 }
 0x269   :  { %v938_v50 = vpop.f32.mrf.mxu3 }
 0x26a   :  { %v914_v51 = vpop.f32.mrf.mxu1 }
 0x26b   :  { %v953_v53 = vpop.f32.mrf.mxu0 }
 0x270   :  { %v927_v56 = vpop.f32.mrf.mxu2 }
 0x271   :  { %v940_v57 = vpop.f32.mrf.mxu3 }
 0x272   :  { %v1047_v59 = vpop.f32.mrf.mxu1 }
 0x273   :  { %v1048_v61 = vadd.f32 %v1047_v59, %v912_v47  ;;  %v1086_v62 = vpop.f32.mrf.mxu0 }
 0x274   :  { %v1087_v63 = vadd.f32 %v1086_v62, %v951_v48 }
 0x275   :  { %v1101_v0 = vadd.f32 %v1093_v58, %v1048_v61 }
 0x276   :  { %v1104_v1 = vadd.f32 %v1096_v60, %v1087_v63 }
 0x277   :  { %v1105_v2 = vmax.f32 %v1101_v0, 0.0 }
 0x278   :  { %v1108_v4 = vmax.f32 %v1104_v1, 0.0  ;;  %v1060_v5 = vpop.f32.mrf.mxu2 }
 0x279   :  { %v1109_v8 = vpack.c.bf16 %v1105_v2, %v1105_v2  ;;  %v1061_v7 = vadd.f32 %v1060_v5, %v925_v49  ;;  %v1073_v9 = vpop.f32.mrf.mxu3 }
 0x27a   :  { %v1112_v10 = vpack.c.bf16 %v1108_v4, %v1108_v4  ;;  %v1074_v11 = vadd.f32 %v1073_v9, %v938_v50  ;;  %v1049_v12 = vpop.f32.mrf.mxu1 }
 0x27b   :  { %v1102_v13 = vadd.f32 %v1094_v3, %v1061_v7  ;;  %v1088_v14 = vpop.f32.mrf.mxu0  ;;  %1378 = vmatmul.bf16.vlgmr.msra.gmra.mxu1 %v1109_v8 }
 0x27c   :  { %v1103_v15 = vadd.f32 %v1095_v6, %v1074_v11  ;;  %1417 = vmatmul.bf16.vlgmr.msrb.gmra.mxu0 %v1112_v10 }
 0x27d   :  { %v1106_v52 = vmax.f32 %v1102_v13, 0.0 }
 0x27e   :  { %v1107_v54 = vmax.f32 %v1103_v15, 0.0 }
 0x27f   :  { %v1110_v16 = vpack.c.bf16 %v1106_v52, %v1106_v52 }
 0x280   :  { %v1111_v17 = vpack.c.bf16 %v1107_v54, %v1107_v54  ;;  %v1062_v18 = vpop.f32.mrf.mxu2 }
 0x281   :  { %v1075_v19 = vpop.f32.mrf.mxu3  ;;  %1391 = vmatmul.bf16.vlgmr.msra.gmra.mxu2 %v1110_v16 }
 0x282   :  { %1404 = vmatmul.bf16.vlgmr.msra.gmra.mxu3 %v1111_v17 }
 0x2f8   :  { %v1379_v20 = vpop.f32.mrf.mxu1 }
 0x2f9   :  { %v1418_v25 = vpop.f32.mrf.mxu0  ;;  %v1380_v23 = vadd.f32 %v1379_v20, %v1177_v27 }
 0x300   :  { %v1381_v21 = vpop.f32.mrf.mxu1 }
 0x301   :  { %v1420_v22 = vpop.f32.mrf.mxu0 }
 0x304   :  { %v1392_v24 = vpop.f32.mrf.mxu2 }
 0x305   :  { %v1393_v26 = vadd.f32 %v1392_v24, %v1380_v23  ;;  %v1405_v28 = vpop.f32.mrf.mxu3 }
 0x307   :  { %v1406_v29 = vadd.f32 %v1405_v28, %v1393_v26 }
 0x309   :  { %v1419_v30 = vadd.f32 %v1418_v25, %v1406_v29 }
 0x30b   :  { %1423 = vst.msk [vmem:[#allocation2] sm:$0xff] %vm1422_vm10, %v1419_v30 }
 0x30c   :  { %v1394_v31 = vpop.f32.mrf.mxu2  ;;  %1434 = dma.vmem_to_hbm [thread:$0]  %s1430_s19, 128, %s1432_s21, [#allocation3]  }
 0x30d   :  { %v1407_v32 = vpop.f32.mrf.mxu3 }
 0x30e   :  { %2140 = dma.done.wait [#allocation3], 128  }
 0x30f   :  { %2141 = vsyncadd [#allocation3], 4294967168 }
 0x310   :  { %1439 = vsyncpa [#allocation3], 1 }

</bundles_post_ra>
